<compile_context>
chip_gen: v7x
topology: tpu7x:2x2x1
jax: 0.10.0
libtpu: 0.0.40
codegen_flags: <defaults>
</compile_context>

<pallas_src>
import functools

import jax
import jax.numpy as jnp
from jax import lax
from jax.experimental import pallas as pl
from jax.experimental.pallas import tpu as pltpu


# -----------------------------------------------------------------------------
# One-time probe: is pltpu.roll usable, and which way does `shift` point?
# Returns fn(axis_len, amount) -> static shift realizing a LEFT shift
#     shifted[p] = x[(p + amount) % axis_len]
# or None, in which case the kernel uses the concat-based shift.
# -----------------------------------------------------------------------------
@functools.lru_cache(maxsize=None)
def _roll_left_shift_arg():
    n = 256
    x = jnp.arange(8 * n, dtype=jnp.float32).reshape(8, n)

    def probe_kernel(x_ref, o_ref):
        o_ref[...] = pltpu.roll(x_ref[...], n - 1, axis=-1)

    try:
        out = jax.block_until_ready(
            pl.pallas_call(
                probe_kernel,
                out_shape=jax.ShapeDtypeStruct((8, n), jnp.float32),
            )(x))
    except Exception:
        return None
    if jnp.array_equal(out, jnp.roll(x, -1, axis=-1)):      # jnp.roll convention
        return lambda axis_len, amount: (axis_len - amount) % axis_len
    if jnp.array_equal(out, jnp.roll(x, 1, axis=-1)):       # reversed convention
        return lambda axis_len, amount: amount % axis_len
    return None


def _vmem_budget_bytes():
    try:
        cap = pltpu.get_tpu_info().vmem_capacity_bytes
    except Exception:
        cap = 64 * 1024 * 1024          # v7x physical VMEM (most conservative gen)
    return cap // 2                     # leave headroom for compiler scratch


def _maxpool_s1_kernel(kernel_size, h, w, roll_shifts, x_ref, o_ref):
    """Stride-1, replicate-padded k x k max pool on a (BC, H*W) block.

    x_ref / o_ref: (BC, H*W) with H*W on lanes, channels on sublanes.
    out[p] = max over the k x k window anchored at p, clamped at the right /
    bottom image edges -- exactly the stride-1 pool of the replicate-padded map.
    """
    hw = h * w
    f = x_ref[...]

    # Hoisted once and pre-broadcast (JAX does not CSE broadcast_in_dim in loops).
    pos = lax.broadcasted_iota(jnp.int32, (1, hw), 1)
    last_col = jnp.broadcast_to((pos % w) == (w - 1), f.shape)   # last col of each row
    last_row = jnp.broadcast_to(pos >= (hw - w), f.shape)        # last image row

    col_shift, row_shift = roll_shifts if roll_shifts is not None else (None, None)

    def shift_left(g, amount, roll_shift):
        # shifted[p] = g[(p + amount) % hw]; wrapped positions are edge-masked below.
        if roll_shift is not None:
            return pltpu.roll(g, roll_shift, axis=-1)            # XLU, no VMEM copy
        return jnp.concatenate([g[:, amount:], g[:, :amount]], axis=1)

    # W direction: (k-1) x [ shift one column (clamped at right edge), max ].
    if w > 1:
        for _ in range(kernel_size - 1):
            shifted = shift_left(f, 1, col_shift)
            f = jnp.maximum(f, jnp.where(last_col, f, shifted))

    # H direction: (k-1) x [ shift one row (clamped at bottom edge), max ].
    if h > 1:
        for _ in range(kernel_size - 1):
            shifted = shift_left(f, w, row_shift)
            f = jnp.maximum(f, jnp.where(last_row, f, shifted))

    o_ref[...] = f


def _pick_block_channels(nch, hw, itemsize, vmem_budget_bytes,
                         target_block_bytes=4 * 1024 * 1024, min_grid_steps=4):
    """Channel rows per block: big enough to amortize ~0.35us/step overhead,
    small enough that 2x double-buffered (in + out) blocks fit the VMEM budget,
    and small enough that the grid keeps >= ~min_grid_steps steps (pipelining
    overlap + megacore sharding on v7x)."""
    min_rows = max(8, 32 // itemsize)           # sublane tile: 8 f32 / 16 bf16 / 32 i8
    if nch <= min_rows:
        return nch                              # one full block (equal-to-dim is legal)
    row_bytes = max(1, hw * itemsize)

    def rows_for(nbytes):
        return max(min_rows, (nbytes // row_bytes // min_rows) * min_rows)

    bc = rows_for(target_block_bytes)
    # 2 inputs buffers + 2 output buffers of one block each must fit the budget.
    # TODO(synk): for extremely large H*W (>~500x500 f32) tile the H axis across
    # the grid with a (k-1)-row halo instead of taking whole H*W rows.
    bc = min(bc, rows_for((vmem_budget_bytes - (2 << 20)) // 4))
    # Keep a multi-step grid so DMA overlaps compute and both v7x cores get work.
    per_step = -(-nch // min_grid_steps)
    per_step = -(-per_step // min_rows) * min_rows
    bc = min(bc, per_step)
    return max(bc, min_rows)


def maxpool_stride1(x, kernel_size):
    """Equivalent of MaxPoolStride1(kernel_size).forward(x) for NCHW input."""
    assert kernel_size >= 2, "kernel_size=1 would imply stride=0 (invalid in torch too)"
    n, c, h, w = x.shape
    k = kernel_size
    stride = k - 1                              # nn.MaxPool2d(k, pad): stride == pad

    nch = n * c
    hw = h * w
    itemsize = jnp.dtype(x.dtype).itemsize
    x2 = x.reshape(nch, hw)                     # free (contiguous) reshape

    vmem_budget = _vmem_budget_bytes()
    bc = _pick_block_channels(nch, hw, itemsize, vmem_budget)
    grid = (pl.cdiv(nch, bc),)

    # Roll fast path only for 128-aligned lane axes, 32-bit dtypes, tiled sublanes.
    roll_shifts = None
    if hw % 128 == 0 and itemsize == 4 and bc % 8 == 0:
        shift_fn = _roll_left_shift_arg()
        if shift_fn is not None:
            roll_shifts = (shift_fn(hw, 1), shift_fn(hw, w))

    cost = pl.CostEstimate(
        flops=4 * (k - 1) * nch * hw,
        transcendentals=0,
        bytes_accessed=2 * nch * hw * itemsize,
    )

    kern = functools.partial(_maxpool_s1_kernel, k, h, w, roll_shifts)
    pooled_s1 = pl.pallas_call(
        kern,
        out_shape=jax.ShapeDtypeStruct((nch, hw), x.dtype),
        grid_spec=pltpu.PrefetchScalarGridSpec(
            num_scalar_prefetch=0,
            grid=grid,
            in_specs=[pl.BlockSpec((bc, hw), lambda i: (i, 0))],
            out_specs=pl.BlockSpec((bc, hw), lambda i: (i, 0)),
        ),
        compiler_params=pltpu.CompilerParams(
            dimension_semantics=("parallel",),
            vmem_limit_bytes=int(vmem_budget),
        ),
        cost_estimate=cost,
    )(x2)

    pooled_s1 = pooled_s1.reshape(n, c, h, w)
    if stride == 1:
        return pooled_s1                        # canonical k=2 path: fully fused

    # k > 2: apply the MaxPool2d stride (== pad) on the stride-1 pooled result.
    # TODO(synk): fold the stride-(k-1) subsample into the kernel's output block
    # (needs a strided lane gather); k=2 is the canonical darknet configuration.
    h_out = (h - 1) // stride + 1
    w_out = (w - 1) // stride + 1
    return pooled_s1[:, :, ::stride, ::stride][:, :, :h_out, :w_out]


if __name__ == "__main__":
    def torch_reference(x, kernel_size):
        pad = kernel_size - 1
        xp = jnp.pad(x, ((0, 0), (0, 0), (0, pad), (0, pad)), mode="edge")
        return lax.reduce_window(
            xp, -jnp.inf, lax.max,
            window_dimensions=(1, 1, kernel_size, kernel_size),
            window_strides=(1, 1, pad, pad),
            padding="VALID",
        )

    # Canonical darknet configuration: kernel_size=2 (the "stride-1" maxpool).
    # hw=256 is 128-aligned -> exercises the pltpu.roll fast path.
    x = jax.random.normal(jax.random.PRNGKey(0), (2, 4, 16, 16), dtype=jnp.float32)
    out = jax.block_until_ready(maxpool_stride1(x, 2))
    ref = torch_reference(x, 2)
    assert out.shape == ref.shape, (out.shape, ref.shape)
    assert out.dtype == x.dtype
    assert jnp.allclose(out, ref), "Pallas maxpool mismatch vs reference (k=2)"

    # Non-canonical k>2 path (stride = pad = 2), odd non-square spatial dims
    # (hw=195 not 128-aligned -> exercises the concat-shift fallback).
    x3 = jax.random.normal(jax.random.PRNGKey(1), (2, 4, 15, 13), dtype=jnp.float32)
    out3 = jax.block_until_ready(maxpool_stride1(x3, 3))
    ref3 = torch_reference(x3, 3)
    assert out3.shape == ref3.shape, (out3.shape, ref3.shape)
    assert jnp.allclose(out3, ref3), "Pallas maxpool mismatch vs reference (k=3)"

    print("KERNEL_OK")
</pallas_src>

<mosaic_0001>
module attributes {stable_mosaic.version = 11 : i64} {
  func.func @_maxpool_s1_kernel(%arg0: i32, %arg1: memref<8x256xf32, #tpu.memory_space<vmem>>, %arg2: memref<8x256xf32, #tpu.memory_space<vmem>>) attributes {dimension_semantics = [#tpu.dimension_semantics<parallel>], iteration_bounds = array<i64: 1>, scalar_prefetch = 0 : i64, scratch_operands = 0 : i64, tpu.core_type = #tpu.core_type<tc>, window_params = [{transform_indices = @transform_0, window_bounds = array<i64: 8, 256>}, {transform_indices = @transform_1, window_bounds = array<i64: 8, 256>}]} {
    %c0 = arith.constant 0 : index
    %c0_0 = arith.constant 0 : index
    %0 = vector.load %arg1[%c0, %c0_0] : memref<8x256xf32, #tpu.memory_space<vmem>>, vector<8x256xf32>
    %1 = tpu.iota {dimensions = array<i32: 1>} : vector<1x256xi32>
    %c16_i32 = arith.constant 16 : i32
    %c0_i32 = arith.constant 0 : i32
    %2 = arith.cmpi eq, %c16_i32, %c0_i32 : i32
    %c1_i32 = arith.constant 1 : i32
    %3 = arith.select %2, %c1_i32, %c16_i32 : i32
    %4 = vector.broadcast %3 : i32 to vector<1x256xi32>
    %5 = arith.remsi %1, %4 : vector<1x256xi32>
    %c0_i32_1 = arith.constant 0 : i32
    %6 = vector.broadcast %c0_i32_1 : i32 to vector<1x256xi32>
    %7 = arith.cmpi ne, %5, %6 : vector<1x256xi32>
    %c0_i32_2 = arith.constant 0 : i32
    %8 = vector.broadcast %c0_i32_2 : i32 to vector<1x256xi32>
    %9 = arith.cmpi slt, %5, %8 : vector<1x256xi32>
    %c0_i32_3 = arith.constant 0 : i32
    %10 = arith.cmpi slt, %3, %c0_i32_3 : i32
    %11 = vector.broadcast %10 : i1 to vector<1x256xi1>
    %12 = vector.broadcast %11 : vector<1x256xi1> to vector<1x256xi1>
    %13 = arith.xori %9, %12 : vector<1x256xi1>
    %14 = arith.andi %13, %7 : vector<1x256xi1>
    %15 = vector.broadcast %3 : i32 to vector<1x256xi32>
    %16 = arith.addi %5, %15 : vector<1x256xi32>
    %17 = arith.select %14, %16, %5 : vector<1x256xi1>, vector<1x256xi32>
    %c15_i32 = arith.constant 15 : i32
    %18 = vector.broadcast %c15_i32 : i32 to vector<1x256xi32>
    %19 = arith.cmpi eq, %17, %18 : vector<1x256xi32>
    %20 = vector.shape_cast %19 : vector<1x256xi1> to vector<1x256xi1>
    %21 = vector.broadcast %20 : vector<1x256xi1> to vector<8x256xi1>
    %c240_i32 = arith.constant 240 : i32
    %22 = vector.broadcast %c240_i32 : i32 to vector<1x256xi32>
    %23 = arith.cmpi sge, %1, %22 : vector<1x256xi32>
    %24 = vector.shape_cast %23 : vector<1x256xi1> to vector<1x256xi1>
    %25 = vector.broadcast %24 : vector<1x256xi1> to vector<8x256xi1>
    %26 = vector.extract_strided_slice %0 {offsets = [0, 1], sizes = [8, 255], strides = [1, 1]} : vector<8x256xf32> to vector<8x255xf32>
    %27 = vector.extract_strided_slice %0 {offsets = [0, 0], sizes = [8, 1], strides = [1, 1]} : vector<8x256xf32> to vector<8x1xf32>
    %28 = tpu.concatenate %26, %27 in 1 : vector<8x255xf32>, vector<8x1xf32> -> vector<8x256xf32>
    %29 = arith.select %21, %0, %28 : vector<8x256xi1>, vector<8x256xf32>
    %30 = arith.maximumf %0, %29 : vector<8x256xf32>
    %31 = vector.extract_strided_slice %30 {offsets = [0, 16], sizes = [8, 240], strides = [1, 1]} : vector<8x256xf32> to vector<8x240xf32>
    %32 = vector.extract_strided_slice %30 {offsets = [0, 0], sizes = [8, 16], strides = [1, 1]} : vector<8x256xf32> to vector<8x16xf32>
    %33 = tpu.concatenate %31, %32 in 1 : vector<8x240xf32>, vector<8x16xf32> -> vector<8x256xf32>
    %34 = arith.select %25, %30, %33 : vector<8x256xi1>, vector<8x256xf32>
    %35 = arith.maximumf %30, %34 : vector<8x256xf32>
    %c0_4 = arith.constant 0 : index
    %c0_5 = arith.constant 0 : index
    %36 = vector.load %arg2[%c0_4, %c0_5] : memref<8x256xf32, #tpu.memory_space<vmem>>, vector<8x256xf32>
    tpu.vector_store %arg2[%c0_4, %c0_5], %35 {strides = array<i32>} : memref<8x256xf32, #tpu.memory_space<vmem>>, vector<8x256xf32>,
    return
  }
  func.func @transform_0(%arg0: i32) -> (i32, i32) {
    %c0_i32 = arith.constant 0 : i32
    %c0_i32_0 = arith.constant 0 : i32
    return %arg0, %c0_i32 : i32, i32
  }
  func.func @transform_1(%arg0: i32) -> (i32, i32) {
    %c0_i32 = arith.constant 0 : i32
    %c0_i32_0 = arith.constant 0 : i32
    return %arg0, %c0_i32 : i32, i32
  }
}

</mosaic_0001>

<bundles_post_ra>
// kernel: tpu_custom_call.1
= control target key start
LH: loop header
LB: loop body
LE: loop exit
PB: predicated region body
PF: predicated region fallthrough
CT: control target
= control target key end

     0   :  { %6 = vsyncpa [#allocation3], 0  ;;  %s201_s0 = inlined_call_operand.hbm [shape: f32[8,256], index: 0, kind: input, shape index: {}]   ;;  %s202_s1 = inlined_call_operand.hbm [shape: f32[8,256], index: 1, kind: output, shape index: {}]  }
   0x1   :  { %7 = vsyncpa [#allocation4], 0  ;;  %s163_s6 = smov [#allocation2]   ;;  %s115_s10 = scalar_lea.hbm %s201_s0, 256 }
   0x2   :  { %s14_s7 = sshll.u32 %s163_s6, 4  ;;  %p116_p0 = scmp.ne.s32.totalorder %s201_s0, %s115_s10  ;;  %s15_s7 = int_to_ptr.vmem [resolvable:$true] %s14_s7 }
   0x3   :  { %p119_p1 = scmp.lt.u32.totalorder %s115_s10, %s201_s0 }
   0x5   :  { %p121_p2 = pnand %p119_p1, %p116_p0 }
   0x7   :  { %124 = shalt.err (!%p121_p2)
}
   0x8   :  { %s125_s15 = scalar_lea.vmem %s15_s7, 256  ;;  %p130_p4 = scmp.lt.s32.totalorder %s15_s7, %s15_s7 }
   0x9   :  { %p126_p3 = scmp.ne.s32.totalorder %s15_s7, %s125_s15  ;;  %p131_p5 = scmp.lt.s32.totalorder %s125_s15, %s125_s15 }
   0xb   :  { %p132_p6 = por %p131_p5, %p130_p4 }
   0xd   :  { %p133_p7 = pnand %p132_p6, %p126_p3 }
   0xf   :  { %136 = shalt.err (!%p133_p7)
}
  0x10   :  { %17 = dma.hbm_to_vmem [thread:$0]  %s201_s0, 256, %s15_s7, [#allocation3]  }
  0x11   :  { %159 = dma.done.wait [#allocation3], 256  }
  0x12   :  { %160 = vsyncadd [#allocation3], 4294967040  ;;  %v21_v0 = vld [vmem:[#allocation2] sm:$0xff]  ;;  %s164_s18 = smov 127   ;;  %v22_v1 = vld [vmem:[#allocation2 + $0x8] sm:$0xff]  ;;  %v23_v2 = vlaneseq  ;;  %vm68_vm0 = vcmask 1039360  }
  0x13   :  { %64 = vrot.lane.b32.xlu0 %v21_v0, %s164_s18  ;;  %s165_s0 = smov 112   ;;  %vm84_vm3 = vcmask 916480   ;;  %s166_s19 = smov [#allocation5]  }
  0x14   :  { %v24_v3 = vand.u32 127, %v23_v2  ;;  %s102_s20 = sshll.u32 %s166_s19, 4  ;;  %s103_s20 = int_to_ptr.vmem [resolvable:$true] %s102_s20 }
  0x15   :  { %s137_s21 = scalar_lea.vmem %s103_s20, 256  ;;  %p142_p9 = scmp.lt.s32.totalorder %s103_s20, %s103_s20 }
  0x16   :  { %v25_v4 = vadd.s32 128, %v24_v3  ;;  %v30_v5 = vand.u32 15, %v24_v3  ;;  %p138_p8 = scmp.ne.s32.totalorder %s103_s20, %s137_s21  ;;  %p143_p10 = scmp.lt.s32.totalorder %s137_s21, %s137_s21 }
  0x17   :  { %66 = vrot.lane.b32.xlu0 %v22_v1, %s164_s18 }
  0x18   :  { %v37_v7 = vand.u32 15, %v25_v4  ;;  %vm50_vm1 = vcmp.eq.s32.totalorder %v30_v5, 15  ;;  %vm57_vm4 = vcmp.ge.s32.totalorder %v25_v4, 240  ;;  %p144_p11 = por %p143_p10, %p142_p9 }
  0x1a   :  { %vm51_vm2 = vcmp.eq.s32.totalorder %v37_v7, 15  ;;  %p145_p12 = pnand %p144_p11, %p138_p8 }
  0x85   :  { %v65_v6 = vpop.permute.xlu0 %64 }
  0x89   :  { %v67_v8 = vpop.permute.xlu0 %66 }
  0x8a   :  { %v69_v9 = vsel %vm68_vm0, %v65_v6, %v67_v8  ;;  %v73_v10 = vsel %vm68_vm0, %v67_v8, %v65_v6 }
  0x8b   :  { %v74_v11 = vsel %vm50_vm1, %v21_v0, %v69_v9  ;;  %v75_v13 = vsel %vm51_vm2, %v22_v1, %v73_v10 }
  0x8c   :  { %v76_v12 = vmax.f32 %v21_v0, %v74_v11  ;;  %v77_v14 = vmax.f32 %v22_v1, %v75_v13 }
  0x8e   :  { %80 = vrot.lane.b32.xlu1 %v76_v12, %s165_s0 }
  0x92   :  { %82 = vrot.lane.b32.xlu1 %v77_v14, %s165_s0 }
 0x100   :  { %v81_v15 = vpop.permute.xlu1 %80 }
 0x104   :  { %v83_v16 = vpop.permute.xlu1 %82 }
 0x105   :  { %v85_v17 = vsel %vm84_vm3, %v81_v15, %v83_v16  ;;  %v89_v18 = vsel %vm84_vm3, %v83_v16, %v81_v15 }
 0x106   :  { %v91_v19 = vsel %vm57_vm4, %v77_v14, %v89_v18  ;;  %v92_v20 = vmax.f32 %v76_v12, %v85_v17 }
 0x107   :  { %v93_v21 = vmax.f32 %v77_v14, %v91_v19 }
 0x108   :  { %94 = vst [vmem:[#allocation5] sm:$0xff] %v92_v20 }
 0x109   :  { %95 = vst [vmem:[#allocation5 + $0x8] sm:$0xff] %v93_v21 }
 0x10a   :  { %148 = shalt.err (!%p145_p12)
}
 0x10b   :  { %s149_s24 = scalar_lea.hbm %s202_s1, 256 }
 0x10c   :  { %p150_p13 = scmp.ne.s32.totalorder %s202_s1, %s149_s24  ;;  %p153_p0 = scmp.lt.u32.totalorder %s149_s24, %s202_s1 }
 0x10e   :  { %p155_p1 = pnand %p153_p0, %p150_p13 }
 0x110   :  { %158 = shalt.err (!%p155_p1)
}
 0x111   :  { %105 = dma.vmem_to_hbm [thread:$0]  %s103_s20, 256, %s202_s1, [#allocation4]  }
 0x112   :  { %161 = dma.done.wait [#allocation4], 256  }
 0x113   :  { %162 = vsyncadd [#allocation4], 4294967040 }
 0x114   :  { %109 = vsyncpa [#allocation3], 1 }
 0x115   :  { %110 = vsyncpa [#allocation4], 1 }

</bundles_post_ra>
